<compile_context>
chip_gen: v7x
topology: tpu7x:2x2x1
jax: 0.10.0
libtpu: 0.0.40
codegen_flags: <defaults>
</compile_context>

<pallas_src>
import functools

import jax
import jax.numpy as jnp
from jax import lax
from jax.experimental import pallas as pl
from jax.experimental.pallas import tpu as pltpu

INPUT_SIZE = 256
H1, H2, H3 = 128, 128, 64
OUT = 10
PAD = 128                      # lane-padded width for layers 3/4 and the output
DROPOUT_P = 0.5


def _round_up(n, m):
    return ((n + m - 1) // m) * m


def _dropout(h, seed_u, salt, row0, p):
    """Inverted dropout via an integer-threshold select on a stateless hash.

    Each element's bits depend on (global_row, col, seed, salt) so masks are
    reproducible and distinct across batch tiles and across the three dropout
    sites.  keep iff top-24 hash bits >= p * 2^24, scale kept values by 1/(1-p).
    """
    keep_scale = jnp.float32(1.0 / (1.0 - p))
    thr24 = jnp.int32(min(int(round(p * (1 << 24))), (1 << 24) - 1) if p < 1.0 else (1 << 24))

    rows = (lax.broadcasted_iota(jnp.int32, h.shape, 0) + row0).astype(jnp.uint32)
    cols = lax.broadcasted_iota(jnp.int32, h.shape, 1).astype(jnp.uint32)

    k = rows * jnp.uint32(0x9E3779B1) + cols * jnp.uint32(0x85EBCA77)
    k = k ^ (seed_u + jnp.uint32((salt * 0x9E3779B9) & 0xFFFFFFFF))
    # murmur3 fmix32
    k = k ^ (k >> jnp.uint32(16))
    k = k * jnp.uint32(0x85EBCA6B)
    k = k ^ (k >> jnp.uint32(13))
    k = k * jnp.uint32(0xC2B2AE35)
    k = k ^ (k >> jnp.uint32(16))

    bits24 = (k >> jnp.uint32(8)).astype(jnp.int32)      # uniform in [0, 2^24)
    return jnp.where(bits24 >= thr24, h * keep_scale, jnp.float32(0.0))


def _mlp_dropout_kernel(seed_ref, x_ref, w1_ref, b1_ref, w2_ref, b2_ref,
                        w3_ref, b3_ref, w4_ref, b4_ref, o_ref,
                        *, training: bool, p: float):
    """One batch tile of the forward pass (weights resident across the grid)."""
    tb = x_ref.shape[0]
    row0 = pl.program_id(0) * tb                 # global row offset of this tile
    seed_u = seed_ref[0].astype(jnp.uint32)

    def maybe_dropout(h, salt):
        if (not training) or p <= 0.0:
            return h
        return _dropout(h, seed_u, salt, row0, p)

    x = x_ref[...]                               # (TB, 256) bf16

    # fc1 + relu + dropout
    h = jnp.dot(x, w1_ref[...], preferred_element_type=jnp.float32) + b1_ref[...]
    h = jnp.maximum(h, 0.0)
    h = maybe_dropout(h, 1)

    # fc2 + tanh + dropout
    h = jnp.dot(h.astype(jnp.bfloat16), w2_ref[...],
                preferred_element_type=jnp.float32) + b2_ref[...]
    h = jnp.tanh(h)
    h = maybe_dropout(h, 2)

    # fc3 + relu + dropout   (lane-padded 64 -> 128; padded lanes stay exactly 0)
    h = jnp.dot(h.astype(jnp.bfloat16), w3_ref[...],
                preferred_element_type=jnp.float32) + b3_ref[...]
    h = jnp.maximum(h, 0.0)
    h = maybe_dropout(h, 3)

    # fc4 (lane-padded 10 -> 128)
    logits = jnp.dot(h.astype(jnp.bfloat16), w4_ref[...],
                     preferred_element_type=jnp.float32) + b4_ref[...]

    # log_softmax over the first OUT lanes; mask padded lanes before the reductions.
    lane = lax.broadcasted_iota(jnp.int32, logits.shape, 1)
    logits = jnp.where(lane < OUT, logits, jnp.float32(-1e30))
    m = jnp.max(logits, axis=1, keepdims=True)
    shifted = logits - m
    lse = jnp.log(jnp.sum(jnp.exp(shifted), axis=1, keepdims=True))
    o_ref[...] = (shifted - lse).astype(o_ref.dtype)


def fully_connected_nn_with_dropout(x, params, seed, *, training=True,
                                    dropout_prob=DROPOUT_P, batch_tile=None):
    """x: (B, C, H, W) or (B, 256) float32. params: dict of w1..w4 (in,out), b1..b4 (1,out)."""
    B = x.shape[0]
    x2d = x.reshape(B, -1).astype(jnp.bfloat16)          # x.view(x.size(0), -1), bf16 for MXU/DMA
    assert x2d.shape[1] == INPUT_SIZE

    # Batch tile: multiple of 16 (bf16 sublane packing); 512 fills the MXU M dim
    # at large batch while staying far under v7x's 64 MiB VMEM.
    if batch_tile is None:
        TB = 512 if B >= 512 else _round_up(B, 16)
    else:
        TB = _round_up(int(batch_tile), 16)
    Bp = _round_up(B, TB)
    if Bp != B:
        x2d = jnp.pad(x2d, ((0, Bp - B), (0, 0)))

    bf = jnp.bfloat16
    f32 = jnp.float32
    w1 = params["w1"].astype(bf)
    b1 = params["b1"].astype(f32)
    w2 = params["w2"].astype(bf)
    b2 = params["b2"].astype(f32)
    w3 = jnp.pad(params["w3"], ((0, 0), (0, PAD - H3))).astype(bf)          # (128,128)
    b3 = jnp.pad(params["b3"], ((0, 0), (0, PAD - H3))).astype(f32)          # (1,128)
    w4 = jnp.pad(params["w4"], ((0, PAD - H3), (0, PAD - OUT))).astype(bf)   # (128,128)
    b4 = jnp.pad(params["b4"], ((0, 0), (0, PAD - OUT))).astype(f32)         # (1,128)

    seed_arr = jnp.asarray([seed], dtype=jnp.int32)

    kernel = functools.partial(_mlp_dropout_kernel,
                               training=bool(training), p=float(dropout_prob))

    const = lambda i, s: (0, 0)     # weights/biases: resident, never re-fetched
    grid_spec = pltpu.PrefetchScalarGridSpec(
        num_scalar_prefetch=1,                      # seed lands in SMEM
        grid=(Bp // TB,),
        in_specs=[
            pl.BlockSpec((TB, INPUT_SIZE), lambda i, s: (i, 0)),   # x tile
            pl.BlockSpec((INPUT_SIZE, H1), const),                 # w1
            pl.BlockSpec((1, H1), const),                          # b1
            pl.BlockSpec((H1, H2), const),                         # w2
            pl.BlockSpec((1, H2), const),                          # b2
            pl.BlockSpec((H2, PAD), const),                        # w3 (padded)
            pl.BlockSpec((1, PAD), const),                         # b3 (padded)
            pl.BlockSpec((PAD, PAD), const),                       # w4 (padded)
            pl.BlockSpec((1, PAD), const),                         # b4 (padded)
        ],
        out_specs=pl.BlockSpec((TB, PAD), lambda i, s: (i, 0)),    # lane-dense output
    )

    out = pl.pallas_call(
        kernel,
        out_shape=jax.ShapeDtypeStruct((Bp, PAD), jnp.float32),
        grid_spec=grid_spec,
        compiler_params=pltpu.CompilerParams(
            dimension_semantics=("parallel",),
            vmem_limit_bytes=32 * 1024 * 1024,      # safe on v7x's smaller VMEM
        ),
    )(seed_arr, x2d, w1, b1, w2, b2, w3, b3, w4, b4)

    return out[:B, :OUT]


def init_params(key):
    """Deterministic init mimicking nn.Linear's U(-1/sqrt(fan_in), 1/sqrt(fan_in)).
    Weights stored pre-transposed as (in, out)."""
    dims = [(INPUT_SIZE, H1), (H1, H2), (H2, H3), (H3, OUT)]
    params = {}
    for i, (fan_in, fan_out) in enumerate(dims, start=1):
        key, kw, kb = jax.random.split(key, 3)
        bound = 1.0 / jnp.sqrt(fan_in)
        params[f"w{i}"] = jax.random.uniform(
            kw, (fan_in, fan_out), jnp.float32, -bound, bound)
        params[f"b{i}"] = jax.random.uniform(
            kb, (1, fan_out), jnp.float32, -bound, bound)
    return params


def _reference_eval(x, params):
    """Pure-JAX reference (dropout disabled), with the same bf16-matmul rounding."""
    def lin(h, w, b):
        return jnp.dot(h.astype(jnp.bfloat16), w.astype(jnp.bfloat16),
                       preferred_element_type=jnp.float32) + b
    h = x.reshape(x.shape[0], -1)
    h = jnp.maximum(lin(h, params["w1"], params["b1"]), 0.0)
    h = jnp.tanh(lin(h, params["w2"], params["b2"]))
    h = jnp.maximum(lin(h, params["w3"], params["b3"]), 0.0)
    logits = lin(h, params["w4"], params["b4"])
    return jax.nn.log_softmax(logits, axis=1)


if __name__ == "__main__":
    key = jax.random.PRNGKey(0)
    key, kx, kp = jax.random.split(key, 3)

    # Small NCHW input: 8 x (1, 16, 16) -> flattens to 256 features.
    x = jax.random.normal(kx, (8, 1, 16, 16), dtype=jnp.float32)
    params = init_params(kp)

    # Eval-mode correctness check (single batch tile).
    out_eval = jax.block_until_ready(
        fully_connected_nn_with_dropout(x, params, seed=0, training=False))
    ref = _reference_eval(x, params)
    assert out_eval.shape == (8, OUT)
    assert jnp.allclose(out_eval, ref, atol=5e-3, rtol=5e-3), "eval-mode mismatch"

    # Multi-tile grid path: B=40 with batch_tile=16 -> padded to 48, grid of 3.
    key, kx2 = jax.random.split(key)
    x_big = jax.random.normal(kx2, (40, 1, 16, 16), dtype=jnp.float32)
    out_big = jax.block_until_ready(
        fully_connected_nn_with_dropout(x_big, params, seed=0, training=False,
                                        batch_tile=16))
    ref_big = _reference_eval(x_big, params)
    assert out_big.shape == (40, OUT)
    assert jnp.allclose(out_big, ref_big, atol=5e-3, rtol=5e-3), "gridded eval mismatch"

    # Training-mode run (dropout active, in-kernel hash PRNG).
    out_train = jax.block_until_ready(
        fully_connected_nn_with_dropout(x, params, seed=1234, training=True))
    assert out_train.shape == (8, OUT)
    assert bool(jnp.all(jnp.isfinite(out_train)))
    # log_softmax rows must exponentiate-sum to ~1
    assert jnp.allclose(jnp.sum(jnp.exp(out_train), axis=1), 1.0, atol=1e-3)

    print("KERNEL_OK")
</pallas_src>

<mosaic_0001>
module attributes {stable_mosaic.version = 11 : i64} {
  func.func @_mlp_dropout_kernel(%arg0: i32, %arg1: memref<1xi32, #tpu.memory_space<smem>>, %arg2: memref<16x256xbf16, #tpu.memory_space<vmem>>, %arg3: memref<256x128xbf16, #tpu.memory_space<vmem>>, %arg4: memref<1x128xf32, #tpu.memory_space<vmem>>, %arg5: memref<128x128xbf16, #tpu.memory_space<vmem>>, %arg6: memref<1x128xf32, #tpu.memory_space<vmem>>, %arg7: memref<128x128xbf16, #tpu.memory_space<vmem>>, %arg8: memref<1x128xf32, #tpu.memory_space<vmem>>, %arg9: memref<128x128xbf16, #tpu.memory_space<vmem>>, %arg10: memref<1x128xf32, #tpu.memory_space<vmem>>, %arg11: memref<16x128xf32, #tpu.memory_space<vmem>>) attributes {dimension_semantics = [#tpu.dimension_semantics<parallel>], iteration_bounds = array<i64: 1>, scalar_prefetch = 1 : i64, scratch_operands = 0 : i64, tpu.core_type = #tpu.core_type<tc>, window_params = [{transform_indices = @transform_0, window_bounds = array<i64: 16, 256>}, {pipeline_mode = #tpu.pipeline_mode<synchronous>, transform_indices = @transform_1, window_bounds = array<i64: 256, 128>}, {pipeline_mode = #tpu.pipeline_mode<synchronous>, transform_indices = @transform_2, window_bounds = array<i64: 1, 128>}, {pipeline_mode = #tpu.pipeline_mode<synchronous>, transform_indices = @transform_3, window_bounds = array<i64: 128, 128>}, {pipeline_mode = #tpu.pipeline_mode<synchronous>, transform_indices = @transform_4, window_bounds = array<i64: 1, 128>}, {pipeline_mode = #tpu.pipeline_mode<synchronous>, transform_indices = @transform_5, window_bounds = array<i64: 128, 128>}, {pipeline_mode = #tpu.pipeline_mode<synchronous>, transform_indices = @transform_6, window_bounds = array<i64: 1, 128>}, {pipeline_mode = #tpu.pipeline_mode<synchronous>, transform_indices = @transform_7, window_bounds = array<i64: 128, 128>}, {pipeline_mode = #tpu.pipeline_mode<synchronous>, transform_indices = @transform_8, window_bounds = array<i64: 1, 128>}, {transform_indices = @transform_9, window_bounds = array<i64: 16, 128>}]} {
    %c0 = arith.constant 0 : index
    %c0_0 = arith.constant 0 : index
    %0 = vector.load %arg2[%c0, %c0_0] : memref<16x256xbf16, #tpu.memory_space<vmem>>, vector<16x256xbf16>
    %c0_1 = arith.constant 0 : index
    %c0_2 = arith.constant 0 : index
    %1 = vector.load %arg3[%c0_1, %c0_2] : memref<256x128xbf16, #tpu.memory_space<vmem>>, vector<256x128xbf16>
    %cst = arith.constant dense<0.000000e+00> : vector<16x128xf32>
    %2 = tpu.matmul %0, %1, %cst {dimension_numbers = #tpu.dot_dimension_numbers<[1], [0], [0], [1], [0, 0, 1, 1], [], []>} : vector<16x256xbf16>, vector<256x128xbf16>, vector<16x128xf32> -> vector<16x128xf32>
    %c0_3 = arith.constant 0 : index
    %c0_4 = arith.constant 0 : index
    %3 = vector.load %arg4[%c0_3, %c0_4] : memref<1x128xf32, #tpu.memory_space<vmem>>, vector<1x128xf32>
    %4 = vector.broadcast %3 : vector<1x128xf32> to vector<16x128xf32>
    %5 = arith.addf %2, %4 : vector<16x128xf32>
    %cst_5 = arith.constant 0.000000e+00 : f32
    %6 = vector.broadcast %cst_5 : f32 to vector<16x128xf32>
    %7 = arith.maximumf %5, %6 : vector<16x128xf32>
    %8 = arith.truncf %7 : vector<16x128xf32> to vector<16x128xbf16>
    %c0_6 = arith.constant 0 : index
    %c0_7 = arith.constant 0 : index
    %9 = vector.load %arg5[%c0_6, %c0_7] : memref<128x128xbf16, #tpu.memory_space<vmem>>, vector<128x128xbf16>
    %cst_8 = arith.constant dense<0.000000e+00> : vector<16x128xf32>
    %10 = tpu.matmul %8, %9, %cst_8 {dimension_numbers = #tpu.dot_dimension_numbers<[1], [0], [0], [1], [0, 0, 1, 1], [], []>} : vector<16x128xbf16>, vector<128x128xbf16>, vector<16x128xf32> -> vector<16x128xf32>
    %c0_9 = arith.constant 0 : index
    %c0_10 = arith.constant 0 : index
    %11 = vector.load %arg6[%c0_9, %c0_10] : memref<1x128xf32, #tpu.memory_space<vmem>>, vector<1x128xf32>
    %12 = vector.broadcast %11 : vector<1x128xf32> to vector<16x128xf32>
    %13 = arith.addf %10, %12 : vector<16x128xf32>
    %14 = math.tanh %13 : vector<16x128xf32>
    %15 = arith.truncf %14 : vector<16x128xf32> to vector<16x128xbf16>
    %c0_11 = arith.constant 0 : index
    %c0_12 = arith.constant 0 : index
    %16 = vector.load %arg7[%c0_11, %c0_12] : memref<128x128xbf16, #tpu.memory_space<vmem>>, vector<128x128xbf16>
    %cst_13 = arith.constant dense<0.000000e+00> : vector<16x128xf32>
    %17 = tpu.matmul %15, %16, %cst_13 {dimension_numbers = #tpu.dot_dimension_numbers<[1], [0], [0], [1], [0, 0, 1, 1], [], []>} : vector<16x128xbf16>, vector<128x128xbf16>, vector<16x128xf32> -> vector<16x128xf32>
    %c0_14 = arith.constant 0 : index
    %c0_15 = arith.constant 0 : index
    %18 = vector.load %arg8[%c0_14, %c0_15] : memref<1x128xf32, #tpu.memory_space<vmem>>, vector<1x128xf32>
    %19 = vector.broadcast %18 : vector<1x128xf32> to vector<16x128xf32>
    %20 = arith.addf %17, %19 : vector<16x128xf32>
    %cst_16 = arith.constant 0.000000e+00 : f32
    %21 = vector.broadcast %cst_16 : f32 to vector<16x128xf32>
    %22 = arith.maximumf %20, %21 : vector<16x128xf32>
    %23 = arith.truncf %22 : vector<16x128xf32> to vector<16x128xbf16>
    %c0_17 = arith.constant 0 : index
    %c0_18 = arith.constant 0 : index
    %24 = vector.load %arg9[%c0_17, %c0_18] : memref<128x128xbf16, #tpu.memory_space<vmem>>, vector<128x128xbf16>
    %cst_19 = arith.constant dense<0.000000e+00> : vector<16x128xf32>
    %25 = tpu.matmul %23, %24, %cst_19 {dimension_numbers = #tpu.dot_dimension_numbers<[1], [0], [0], [1], [0, 0, 1, 1], [], []>} : vector<16x128xbf16>, vector<128x128xbf16>, vector<16x128xf32> -> vector<16x128xf32>
    %c0_20 = arith.constant 0 : index
    %c0_21 = arith.constant 0 : index
    %26 = vector.load %arg10[%c0_20, %c0_21] : memref<1x128xf32, #tpu.memory_space<vmem>>, vector<1x128xf32>
    %27 = vector.broadcast %26 : vector<1x128xf32> to vector<16x128xf32>
    %28 = arith.addf %25, %27 : vector<16x128xf32>
    %29 = tpu.iota {dimensions = array<i32: 1>} : vector<16x128xi32>
    %c10_i32 = arith.constant 10 : i32
    %30 = vector.broadcast %c10_i32 : i32 to vector<16x128xi32>
    %31 = arith.cmpi slt, %29, %30 : vector<16x128xi32>
    %cst_22 = arith.constant -1.000000e+30 : f32
    %32 = vector.broadcast %cst_22 : f32 to vector<16x128xf32>
    %33 = arith.select %31, %28, %32 : vector<16x128xi1>, vector<16x128xf32>
    %cst_23 = arith.constant dense<0xFF800000> : vector<16xf32>
    %34 = vector.multi_reduction <maximumf>, %33, %cst_23 [1] : vector<16x128xf32> to vector<16xf32>
    %35 = vector.shape_cast %34 : vector<16xf32> to vector<16x1xf32>
    %36 = vector.broadcast %35 : vector<16x1xf32> to vector<16x128xf32>
    %37 = arith.subf %33, %36 : vector<16x128xf32>
    %38 = math.exp %37 : vector<16x128xf32>
    %cst_24 = arith.constant dense<0.000000e+00> : vector<16xf32>
    %39 = vector.multi_reduction <add>, %38, %cst_24 [1] : vector<16x128xf32> to vector<16xf32>
    %40 = vector.shape_cast %39 : vector<16xf32> to vector<16x1xf32>
    %41 = math.log %40 : vector<16x1xf32>
    %42 = vector.broadcast %41 : vector<16x1xf32> to vector<16x128xf32>
    %43 = arith.subf %37, %42 : vector<16x128xf32>
    %c0_25 = arith.constant 0 : index
    %c0_26 = arith.constant 0 : index
    %44 = vector.load %arg11[%c0_25, %c0_26] : memref<16x128xf32, #tpu.memory_space<vmem>>, vector<16x128xf32>
    tpu.vector_store %arg11[%c0_25, %c0_26], %43 {strides = array<i32>} : memref<16x128xf32, #tpu.memory_space<vmem>>, vector<16x128xf32>,
    return
  }
  func.func @transform_0(%arg0: i32, %arg1: memref<1xi32, #tpu.memory_space<smem>>) -> (i32, i32) {
    %c0_i32 = arith.constant 0 : i32
    %c0_i32_0 = arith.constant 0 : i32
    return %arg0, %c0_i32 : i32, i32
  }
  func.func @transform_1(%arg0: i32, %arg1: memref<1xi32, #tpu.memory_space<smem>>) -> (i32, i32) {
    %c0_i32 = arith.constant 0 : i32
    %c0_i32_0 = arith.constant 0 : i32
    %c0_i32_1 = arith.constant 0 : i32
    return %c0_i32, %c0_i32_0 : i32, i32
  }
  func.func @transform_2(%arg0: i32, %arg1: memref<1xi32, #tpu.memory_space<smem>>) -> (i32, i32) {
    %c0_i32 = arith.constant 0 : i32
    %c0_i32_0 = arith.constant 0 : i32
    %c0_i32_1 = arith.constant 0 : i32
    return %c0_i32, %c0_i32_0 : i32, i32
  }
  func.func @transform_3(%arg0: i32, %arg1: memref<1xi32, #tpu.memory_space<smem>>) -> (i32, i32) {
    %c0_i32 = arith.constant 0 : i32
    %c0_i32_0 = arith.constant 0 : i32
    %c0_i32_1 = arith.constant 0 : i32
    return %c0_i32, %c0_i32_0 : i32, i32
  }
  func.func @transform_4(%arg0: i32, %arg1: memref<1xi32, #tpu.memory_space<smem>>) -> (i32, i32) {
    %c0_i32 = arith.constant 0 : i32
    %c0_i32_0 = arith.constant 0 : i32
    %c0_i32_1 = arith.constant 0 : i32
    return %c0_i32, %c0_i32_0 : i32, i32
  }
  func.func @transform_5(%arg0: i32, %arg1: memref<1xi32, #tpu.memory_space<smem>>) -> (i32, i32) {
    %c0_i32 = arith.constant 0 : i32
    %c0_i32_0 = arith.constant 0 : i32
    %c0_i32_1 = arith.constant 0 : i32
    return %c0_i32, %c0_i32_0 : i32, i32
  }
  func.func @transform_6(%arg0: i32, %arg1: memref<1xi32, #tpu.memory_space<smem>>) -> (i32, i32) {
    %c0_i32 = arith.constant 0 : i32
    %c0_i32_0 = arith.constant 0 : i32
    %c0_i32_1 = arith.constant 0 : i32
    return %c0_i32, %c0_i32_0 : i32, i32
  }
  func.func @transform_7(%arg0: i32, %arg1: memref<1xi32, #tpu.memory_space<smem>>) -> (i32, i32) {
    %c0_i32 = arith.constant 0 : i32
    %c0_i32_0 = arith.constant 0 : i32
    %c0_i32_1 = arith.constant 0 : i32
    return %c0_i32, %c0_i32_0 : i32, i32
  }
  func.func @transform_8(%arg0: i32, %arg1: memref<1xi32, #tpu.memory_space<smem>>) -> (i32, i32) {
    %c0_i32 = arith.constant 0 : i32
    %c0_i32_0 = arith.constant 0 : i32
    %c0_i32_1 = arith.constant 0 : i32
    return %c0_i32, %c0_i32_0 : i32, i32
  }
  func.func @transform_9(%arg0: i32, %arg1: memref<1xi32, #tpu.memory_space<smem>>) -> (i32, i32) {
    %c0_i32 = arith.constant 0 : i32
    %c0_i32_0 = arith.constant 0 : i32
    return %arg0, %c0_i32 : i32, i32
  }
}

</mosaic_0001>

<bundles_post_ra>
// kernel: tpu_custom_call.1
= control target key start
LH: loop header
LB: loop body
LE: loop exit
PB: predicated region body
PF: predicated region fallthrough
CT: control target
= control target key end

     0   :  { %16 = vsyncpa [#allocation5], 0  ;;  %s1244_s0 = inlined_call_operand.<no memory space> [shape: s32[1], index: 0, kind: input, shape index: {}]   ;;  %s1245_s1 = inlined_call_operand.hbm [shape: bf16[16,256], index: 1, kind: input, shape index: {}]   ;;  %s1246_s2 = inlined_call_operand.hbm [shape: bf16[256,128], index: 2, kind: input, shape index: {}]   ;;  %s1247_s3 = inlined_call_operand.vmem [shape: f32[1,128], index: 3, kind: input, shape index: {}]   ;;  %s1248_s4 = inlined_call_operand.hbm [shape: bf16[128,128], index: 4, kind: input, shape index: {}]   ;;  %s1249_s5 = inlined_call_operand.vmem [shape: f32[1,128], index: 5, kind: input, shape index: {}]   ;;  %s1250_s6 = inlined_call_operand.hbm [shape: bf16[128,128], index: 6, kind: input, shape index: {}]   ;;  %s1251_s7 = inlined_call_operand.vmem [shape: f32[1,128], index: 7, kind: input, shape index: {}]   ;;  %s1252_s8 = inlined_call_operand.hbm [shape: bf16[128,128], index: 8, kind: input, shape index: {}]   ;;  %s1253_s9 = inlined_call_operand.vmem [shape: f32[1,128], index: 9, kind: input, shape index: {}]   ;;  %s1254_s10 = inlined_call_operand.hbm [shape: f32[16,128], index: 10, kind: output, shape index: {}]  }
   0x1   :  { %17 = vsyncpa [#allocation8], 0 }
   0x2   :  { %18 = vsyncpa [#allocation11], 0 }
   0x3   :  { %19 = vsyncpa [#allocation6], 0  ;;  %s1045_s12 = smov [#allocation7]   ;;  %s905_s16 = scalar_lea.hbm %s1246_s2, 2048 }
   0x4   :  { %s37_s13 = sshll.u32 %s1045_s12, 4  ;;  %p906_p0 = scmp.ne.s32.totalorder %s1246_s2, %s905_s16  ;;  %s38_s13 = int_to_ptr.vmem [resolvable:$true] %s37_s13 }
   0x5   :  { %p909_p1 = scmp.lt.u32.totalorder %s905_s16, %s1246_s2 }
   0x7   :  { %p911_p2 = pnand %p909_p1, %p906_p0 }
   0x9   :  { %914 = shalt.err (!%p911_p2)
}
   0xa   :  { %s915_s21 = scalar_lea.vmem %s38_s13, 2048  ;;  %p920_p4 = scmp.lt.s32.totalorder %s38_s13, %s38_s13 }
   0xb   :  { %p916_p3 = scmp.ne.s32.totalorder %s38_s13, %s915_s21  ;;  %p921_p5 = scmp.lt.s32.totalorder %s915_s21, %s915_s21 }
   0xd   :  { %p922_p6 = por %p921_p5, %p920_p4 }
   0xf   :  { %p923_p7 = pnand %p922_p6, %p916_p3 }
  0x11   :  { %926 = shalt.err (!%p923_p7)
}
  0x12   :  { %s1046_s22 = smov 64   ;;  %s1047_s23 = smov 4  }
  0x13   :  { %43 = dma.hbm_to_vmem [thread:$0]  %s1246_s2, 2048, %s38_s13, [#allocation8], %s1046_s22, %s1046_s22, %s1047_s23  }
  0x14   :  { %s1048_s0 = smov [#allocation10]   ;;  %s1049_s27 = smov [#allocation4]  }
  0x15   :  { %s65_s26 = sshll.u32 %s1048_s0, 4  ;;  %s25_s28 = sshll.u32 %s1049_s27, 4  ;;  %s66_s26 = int_to_ptr.vmem [resolvable:$true] %s65_s26  ;;  %s26_s28 = int_to_ptr.vmem [resolvable:$true] %s25_s28 }
  0x16   :  { %s927_s11 = scalar_lea.hbm %s1250_s6, 1024 }
  0x17   :  { %p928_p8 = scmp.ne.s32.totalorder %s1250_s6, %s927_s11  ;;  %p931_p9 = scmp.lt.u32.totalorder %s927_s11, %s1250_s6 }
  0x19   :  { %p933_p10 = pnand %p931_p9, %p928_p8 }
  0x1b   :  { %936 = shalt.err (!%p933_p10)
}
  0x1c   :  { %s937_s2 = scalar_lea.vmem %s66_s26, 1024  ;;  %p942_p12 = scmp.lt.s32.totalorder %s66_s26, %s66_s26 }
  0x1d   :  { %p938_p11 = scmp.ne.s32.totalorder %s66_s26, %s937_s2  ;;  %p943_p13 = scmp.lt.s32.totalorder %s937_s2, %s937_s2 }
  0x1f   :  { %p944_p0 = por %p943_p13, %p942_p12 }
  0x21   :  { %p945_p1 = pnand %p944_p0, %p938_p11 }
  0x23   :  { %948 = shalt.err (!%p945_p1)
}
  0x24   :  { %71 = dma.hbm_to_vmem [thread:$0]  %s1250_s6, 1024, %s66_s26, [#allocation11], %s1046_s22, %s1046_s22, %s1047_s23  }
  0x25   :  { %s949_s20 = scalar_lea.hbm %s1245_s1, 256 }
  0x26   :  { %p950_p2 = scmp.ne.s32.totalorder %s1245_s1, %s949_s20  ;;  %p953_p3 = scmp.lt.u32.totalorder %s949_s20, %s1245_s1 }
  0x28   :  { %p955_p4 = pnand %p953_p3, %p950_p2 }
  0x2a   :  { %958 = shalt.err (!%p955_p4)
}
  0x2b   :  { %s959_s27 = scalar_lea.vmem %s26_s28, 256  ;;  %p964_p6 = scmp.lt.s32.totalorder %s26_s28, %s26_s28 }
  0x2c   :  { %p960_p5 = scmp.ne.s32.totalorder %s26_s28, %s959_s27  ;;  %p965_p7 = scmp.lt.s32.totalorder %s959_s27, %s959_s27 }
  0x2e   :  { %p966_p8 = por %p965_p7, %p964_p6 }
  0x30   :  { %p967_p9 = pnand %p966_p8, %p960_p5 }
  0x32   :  { %970 = shalt.err (!%p967_p9)
}
  0x33   :  { %s1050_s6 = smov 128   ;;  %s1051_s26 = smov 8  }
  0x34   :  { %31 = dma.hbm_to_vmem [thread:$0]  %s1245_s1, 256, %s26_s28, [#allocation5], %s1050_s6, %s1050_s6, %s1051_s26  }
  0x35   :  { %s1052_s11 = smov [#allocation9]   ;;  %s1053_s14 = smov [#allocation12]  }
  0x36   :  { %s51_s12 = sshll.u32 %s1052_s11, 4  ;;  %s79_s15 = sshll.u32 %s1053_s14, 4  ;;  %s52_s12 = int_to_ptr.vmem [resolvable:$true] %s51_s12  ;;  %s80_s15 = int_to_ptr.vmem [resolvable:$true] %s79_s15 }
  0x37   :  { %s971_s13 = scalar_lea.hbm %s1248_s4, 1024 }
  0x38   :  { %p972_p10 = scmp.ne.s32.totalorder %s1248_s4, %s971_s13  ;;  %p975_p11 = scmp.lt.u32.totalorder %s971_s13, %s1248_s4 }
  0x3a   :  { %p977_p12 = pnand %p975_p11, %p972_p10 }
  0x3c   :  { %980 = shalt.err (!%p977_p12)
}
  0x3d   :  { %s981_s1 = scalar_lea.vmem %s52_s12, 1024  ;;  %p986_p0 = scmp.lt.s32.totalorder %s52_s12, %s52_s12 }
  0x3e   :  { %p982_p13 = scmp.ne.s32.totalorder %s52_s12, %s981_s1  ;;  %p987_p1 = scmp.lt.s32.totalorder %s981_s1, %s981_s1 }
  0x40   :  { %p988_p2 = por %p987_p1, %p986_p0 }
  0x42   :  { %p989_p3 = pnand %p988_p2, %p982_p13 }
  0x44   :  { %992 = shalt.err (!%p989_p3)
}
  0x45   :  { %57 = dma.hbm_to_vmem [thread:$0]  %s1248_s4, 1024, %s52_s12, [#allocation8], %s1046_s22, %s1046_s22, %s1047_s23  }
  0x46   :  { %s993_s0 = scalar_lea.hbm %s1252_s8, 1024 }
  0x47   :  { %p994_p4 = scmp.ne.s32.totalorder %s1252_s8, %s993_s0  ;;  %p997_p5 = scmp.lt.u32.totalorder %s993_s0, %s1252_s8 }
  0x49   :  { %p999_p6 = pnand %p997_p5, %p994_p4 }
  0x4b   :  { %1002 = shalt.err (!%p999_p6)
}
  0x4c   :  { %s1003_s14 = scalar_lea.vmem %s80_s15, 1024  ;;  %p1008_p8 = scmp.lt.s32.totalorder %s80_s15, %s80_s15 }
  0x4d   :  { %p1004_p7 = scmp.ne.s32.totalorder %s80_s15, %s1003_s14  ;;  %p1009_p9 = scmp.lt.s32.totalorder %s1003_s14, %s1003_s14 }
  0x4f   :  { %p1010_p10 = por %p1009_p9, %p1008_p8 }
  0x51   :  { %p1011_p11 = pnand %p1010_p10, %p1004_p7 }
  0x53   :  { %1014 = shalt.err (!%p1011_p11)
}
  0x54   :  { %85 = dma.hbm_to_vmem [thread:$0]  %s1252_s8, 1024, %s80_s15, [#allocation11], %s1046_s22, %s1046_s22, %s1047_s23  }
  0x55   :  { %1037 = dma.done.wait [#allocation5], 256  }
  0x56   :  { %1038 = vsyncadd [#allocation5], 4294967040 }
  0x57   :  { %1039 = dma.done.wait [#allocation8], 3072  }
  0x58   :  { %1040 = vsyncadd [#allocation8], 4294964224 }
  0x59   :  { %1041 = dma.done.wait [#allocation11], 2048  }
  0x5a   :  { %1042 = vsyncadd [#allocation11], 4294965248  ;;  %v1054_v0 = vmov 0.0   ;;  %v850_v1 = vld [vmem:[#allocation7 + $0x40] sm:$0xff]   ;;  %v852_v3 = vld [vmem:[#allocation7 + $0x48] sm:$0xff]   ;;  %vm1055_vm0 = vmmov 0  }
  0x5b   :  { %778 = vmatprep.subr.bf16.mxu1 %v1054_v0  ;;  %v851_v2 = vld [vmem:[#allocation7] sm:$0xff]   ;;  %729 = vmatprep.subr.bf16.mxu0 %v850_v1  ;;  %v853_v4 = vld [vmem:[#allocation7 + $0x8] sm:$0xff]   ;;  %v854_v5 = vld [vmem:[#allocation7 + $0x50] sm:$0xff]  }
  0x5c   :  { %730 = vmatpush3.bf16.msra.mxu0 %v851_v2  ;;  %v855_v6 = vld [vmem:[#allocation7 + $0x10] sm:$0xff]   ;;  %v856_v7 = vld [vmem:[#allocation7 + $0x58] sm:$0xff]   ;;  %v858_v9 = vld [vmem:[#allocation7 + $0x60] sm:$0xff]   ;;  %794 = vmatprep.mubr.msk.bf16.mxu1 %vm1055_vm0, %v1054_v0 }
  0x5d   :  { %731 = vmatprep.subr.bf16.mxu0 %v852_v3  ;;  %v857_v8 = vld [vmem:[#allocation7 + $0x18] sm:$0xff]   ;;  %v859_v10 = vld [vmem:[#allocation7 + $0x20] sm:$0xff]   ;;  %v860_v11 = vld [vmem:[#allocation7 + $0x68] sm:$0xff]  }
  0x5e   :  { %v861_v12 = vld [vmem:[#allocation7 + $0x28] sm:$0xff]   ;;  %v868_v13 = vld [vmem:[#allocation4 + $0x4] ss:$8 sps:$4 sm:$0xff]   ;;  %v869_v14 = vld [vmem:[#allocation9] sm:$0xff]  }
  0x5f   :  { %v862_v15 = vld [vmem:[#allocation7 + $0x70] sm:$0xff]   ;;  %283 = vmatprep.mubr.bf16.mxu0 %v868_v13  ;;  %779 = vmatpush3.bf16.msra.mxu1 %v869_v14  ;;  %v870_v16 = vld [vmem:[#allocation9 + $0x8] sm:$0xff]   ;;  %v864_v18 = vld [vmem:[#allocation7 + $0x78] sm:$0xff]  }
  0x60   :  { %732 = vmatpush3.bf16.msra.mxu0 %v853_v4  ;;  %v863_v17 = vld [vmem:[#allocation7 + $0x30] sm:$0xff]   ;;  %780 = vmatprep.subr.bf16.mxu1 %v1054_v0  ;;  %v865_v20 = vld [vmem:[#allocation7 + $0x38] sm:$0xff]   ;;  %v873_v23 = vld [vmem:[#allocation9 + $0x20] sm:$0xff]  }
  0x61   :  { %733 = vmatprep.subr.bf16.mxu0 %v854_v5  ;;  %v871_v19 = vld [vmem:[#allocation9 + $0x10] sm:$0xff]   ;;  %v872_v21 = vld [vmem:[#allocation9 + $0x18] sm:$0xff]   ;;  %v874_v24 = vld [vmem:[#allocation9 + $0x28] sm:$0xff]  }
  0x62   :  { %v866_v22 = vld [vmem:[#allocation4] ss:$8 sps:$4 sm:$0xff]   ;;  %v877_v27 = vld [vmem:[#allocation10] sm:$0xff]   ;;  %v878_v28 = vld [vmem:[#allocation10 + $0x8] sm:$0xff]  }
  0x63   :  { %781 = vmatpush3.bf16.msra.mxu1 %v870_v16  ;;  %v875_v25 = vld [vmem:[#allocation9 + $0x30] sm:$0xff]   ;;  %v876_v26 = vld [vmem:[#allocation9 + $0x38] sm:$0xff]   ;;  %v881_v43 = vld [vmem:[#allocation10 + $0x20] sm:$0xff]  }
  0x64   :  { %734 = vmatpush3.bf16.msra.mxu0 %v855_v6  ;;  %782 = vmatprep.subr.bf16.mxu1 %v1054_v0  ;;  %v879_v29 = vld [vmem:[#allocation10 + $0x10] sm:$0xff]   ;;  %v880_v30 = vld [vmem:[#allocation10 + $0x18] sm:$0xff]   ;;  %v882_v44 = vld [vmem:[#allocation10 + $0x28] sm:$0xff]  }
  0x65   :  { %735 = vmatprep.subr.bf16.mxu0 %v856_v7  ;;  %v683_v32 = vld [vmem:[%s1247_s3] ss:$0 sm:$0xff]  ;;  %v884_v46 = vld [vmem:[#allocation10 + $0x38] sm:$0xff]   ;;  %v885_v47 = vld [vmem:[#allocation12] sm:$0xff]  }
  0x66   :  { %v883_v45 = vld [vmem:[#allocation10 + $0x30] sm:$0xff]   ;;  %v886_v48 = vld [vmem:[#allocation12 + $0x8] sm:$0xff]   ;;  %v888_v50 = vld [vmem:[#allocation12 + $0x18] sm:$0xff]  }
  0x67   :  { %783 = vmatpush3.bf16.msra.mxu1 %v871_v19  ;;  %v887_v49 = vld [vmem:[#allocation12 + $0x10] sm:$0xff]   ;;  %v889_v51 = vld [vmem:[#allocation12 + $0x20] sm:$0xff]   ;;  %v890_v52 = vld [vmem:[#allocation12 + $0x28] sm:$0xff]  }
  0x68   :  { %736 = vmatpush3.bf16.msra.mxu0 %v857_v8  ;;  %784 = vmatprep.subr.bf16.mxu1 %v1054_v0  ;;  %v702_v53 = vld [vmem:[%s1249_s5] ss:$0 sm:$0xff]  ;;  %v892_v1 = vld [vmem:[#allocation12 + $0x38] sm:$0xff]  }
  0x69   :  { %737 = vmatprep.subr.bf16.mxu0 %v858_v9  ;;  %v891_v63 = vld [vmem:[#allocation12 + $0x30] sm:$0xff]  }
  0x6a   :  { %v711_v2 = vld [vmem:[%s1251_s7] ss:$0 sm:$0xff]  ;;  %s1056_s7 = smov [#allocation13]  }
  0x6b   :  { %785 = vmatpush3.bf16.msra.mxu1 %v872_v21 }
  0x6c   :  { %738 = vmatpush3.bf16.msra.mxu0 %v859_v10  ;;  %786 = vmatprep.subr.bf16.mxu1 %v1054_v0 }
  0x6d   :  { %739 = vmatprep.subr.bf16.mxu0 %v860_v11 }
  0x6f   :  { %787 = vmatpush3.bf16.msra.mxu1 %v873_v23 }
  0x70   :  { %740 = vmatpush3.bf16.msra.mxu0 %v861_v12  ;;  %788 = vmatprep.subr.bf16.mxu1 %v1054_v0  ;;  %v637_v12 = vlaneseq }
  0x71   :  { %741 = vmatprep.subr.bf16.mxu0 %v862_v15 }
  0x72   :  { %v638_v13 = vand.u32 127, %v637_v12 }
  0x73   :  { %789 = vmatpush3.bf16.msra.mxu1 %v874_v24 }
  0x74   :  { %742 = vmatpush3.bf16.msra.mxu0 %v863_v17  ;;  %790 = vmatprep.subr.bf16.mxu1 %v1054_v0  ;;  %vm639_vm1 = vcmp.lt.s32.totalorder %v638_v13, 10 }
  0x75   :  { %743 = vmatprep.subr.bf16.mxu0 %v864_v18 }
  0x77   :  { %791 = vmatpush3.bf16.msra.mxu1 %v875_v25 }
  0x78   :  { %744 = vmatpush3.bf16.msra.mxu0 %v865_v20  ;;  %792 = vmatprep.subr.bf16.mxu1 %v1054_v0 }
  0x79   :  { %798 = vmatprep.subr.bf16.mxu0 %v1054_v0 }
  0x7b   :  { %284 = vmatmul.mubr.bf16.vlgmr.msra.gmra.mrb[0].mxu0 %v866_v22  ;;  %793 = vmatpush3.bf16.msra.mxu1 %v876_v26 }
  0x7c   :  { %814 = vmatprep.mubr.msk.bf16.mxu0 %vm1055_vm0, %v1054_v0  ;;  %818 = vmatprep.subr.bf16.mxu1 %v1054_v0 }
  0x7d   :  { %799 = vmatpush3.bf16.msra.mxu0 %v877_v27 }
  0x7e   :  { %800 = vmatprep.subr.bf16.mxu0 %v1054_v0 }
  0x81   :  { %801 = vmatpush3.bf16.msra.mxu0 %v878_v28 }
  0x82   :  { %802 = vmatprep.subr.bf16.mxu0 %v1054_v0 }
  0x85   :  { %803 = vmatpush3.bf16.msra.mxu0 %v879_v29 }
  0x86   :  { %804 = vmatprep.subr.bf16.mxu0 %v1054_v0 }
  0x89   :  { %805 = vmatpush3.bf16.msra.mxu0 %v880_v30 }
  0x8a   :  { %806 = vmatprep.subr.bf16.mxu0 %v1054_v0 }
  0x8d   :  { %807 = vmatpush3.bf16.msra.mxu0 %v881_v43 }
  0x8e   :  { %808 = vmatprep.subr.bf16.mxu0 %v1054_v0 }
  0x91   :  { %809 = vmatpush3.bf16.msra.mxu0 %v882_v44 }
  0x92   :  { %810 = vmatprep.subr.bf16.mxu0 %v1054_v0 }
  0x95   :  { %811 = vmatpush3.bf16.msra.mxu0 %v883_v45 }
  0x96   :  { %812 = vmatprep.subr.bf16.mxu0 %v1054_v0 }
  0x99   :  { %813 = vmatpush3.bf16.msra.mxu0 %v884_v46 }
 0x14e   :  { %v745_v31 = vpop.f32.mrb[0].mxu0 }
 0x14f   :  { %v746_v33 = vpop.f32.mrb[1].mxu0 }
 0x150   :  { %v747_v34 = vadd.f32 %v746_v33, %v745_v31  ;;  %v748_v35 = vpop.f32.mrb[2].mxu0 }
 0x151   :  { %v749_v36 = vpop.f32.mrb[3].mxu0 }
 0x152   :  { %v286_v37 = vadd.f32 %v747_v34, %v683_v32  ;;  %v750_v38 = vadd.f32 %v749_v36, %v748_v35 }
 0x154   :  { %v289_v39 = vadd.f32 %v750_v38, %v683_v32  ;;  %v292_v40 = vmax.f32 %v286_v37, 0.0 }
 0x156   :  { %v293_v41 = vmax.f32 %v289_v39, 0.0 }
 0x158   :  { %v294_v42 = vpack.c.bf16 %v293_v41, %v292_v40 }
 0x15a   :  { %795 = vmatmul.mubr.bf16.vlgmr.msra.gmra.mrb[0].mxu1 %v294_v42 }
 0x15b   :  { %834 = vmatprep.mubr.msk.bf16.mxu1 %vm1055_vm0, %v1054_v0  ;;  %819 = vmatpush3.bf16.msra.mxu1 %v885_v47 }
 0x15c   :  { %820 = vmatprep.subr.bf16.mxu1 %v1054_v0 }
 0x15f   :  { %821 = vmatpush3.bf16.msra.mxu1 %v886_v48 }
 0x160   :  { %822 = vmatprep.subr.bf16.mxu1 %v1054_v0 }
 0x163   :  { %823 = vmatpush3.bf16.msra.mxu1 %v887_v49 }
 0x164   :  { %824 = vmatprep.subr.bf16.mxu1 %v1054_v0 }
 0x167   :  { %825 = vmatpush3.bf16.msra.mxu1 %v888_v50 }
 0x168   :  { %826 = vmatprep.subr.bf16.mxu1 %v1054_v0 }
 0x16b   :  { %827 = vmatpush3.bf16.msra.mxu1 %v889_v51 }
 0x16c   :  { %828 = vmatprep.subr.bf16.mxu1 %v1054_v0 }
 0x16f   :  { %829 = vmatpush3.bf16.msra.mxu1 %v890_v52 }
 0x170   :  { %830 = vmatprep.subr.bf16.mxu1 %v1054_v0 }
 0x173   :  { %831 = vmatpush3.bf16.msra.mxu1 %v891_v63 }
 0x174   :  { %832 = vmatprep.subr.bf16.mxu1 %v1054_v0  ;;  %v720_v0 = vld [vmem:[%s1253_s9] ss:$0 sm:$0xff]  ;;  %s669_s9 = sshll.u32 %s1056_s7, 4  ;;  %s670_s9 = int_to_ptr.vmem [resolvable:$true] %s669_s9 }
 0x175   :  { %s1015_s13 = scalar_lea.vmem %s670_s9, 256  ;;  %p1020_p13 = scmp.lt.s32.totalorder %s670_s9, %s670_s9 }
 0x176   :  { %p1016_p12 = scmp.ne.s32.totalorder %s670_s9, %s1015_s13  ;;  %p1021_p0 = scmp.lt.s32.totalorder %s1015_s13, %s1015_s13 }
 0x177   :  { %833 = vmatpush3.bf16.msra.mxu1 %v892_v1 }
 0x178   :  { %p1022_p1 = por %p1021_p0, %p1020_p13 }
 0x17a   :  { %p1023_p2 = pnand %p1022_p1, %p1016_p12 }
 0x22d   :  { %v400_v54 = vpop.f32.mrb[0].mxu1 }
 0x22e   :  { %v401_v55 = vadd.f32 %v702_v53, %v400_v54  ;;  %v796_v56 = vpop.f32.mrb[1].mxu1 }
 0x22f   :  { %v403_v57 = vpop.f32.mrb[2].mxu1 }
 0x230   :  { %v404_v58 = vadd.f32 %v702_v53, %v403_v57  ;;  %v797_v59 = vpop.f32.mrb[3].mxu1  ;;  %893 = vtanh.f32 %v401_v55 }
 0x232   :  { %895 = vtanh.f32 %v404_v58 }
 0x23a   :  { %v894_v60 = vpop.eup %893 }
 0x23c   :  { %v896_v61 = vpop.eup %895 }
 0x23d   :  { %v409_v62 = vpack.c.bf16 %v896_v61, %v894_v60 }
 0x23f   :  { %815 = vmatmul.mubr.bf16.vlgmr.msra.gmra.mrb[4].mxu0 %v409_v62 }
 0x312   :  { %v515_v3 = vpop.f32.mrb[4].mxu0 }
 0x313   :  { %v516_v4 = vadd.f32 %v711_v2, %v515_v3  ;;  %v816_v5 = vpop.f32.mrb[5].mxu0 }
 0x314   :  { %v518_v6 = vpop.f32.mrb[6].mxu0 }
 0x315   :  { %v519_v7 = vadd.f32 %v711_v2, %v518_v6  ;;  %v817_v8 = vpop.f32.mrb[7].mxu0  ;;  %v522_v9 = vmax.f32 %v516_v4, 0.0 }
 0x317   :  { %v523_v10 = vmax.f32 %v519_v7, 0.0 }
 0x319   :  { %v524_v11 = vpack.c.bf16 %v523_v10, %v522_v9 }
 0x31b   :  { %835 = vmatmul.mubr.bf16.vlgmr.msra.gmra.mrb[4].mxu1 %v524_v11 }
 0x3ee   :  { %v630_v14 = vpop.f32.mrb[4].mxu1 }
 0x3ef   :  { %v631_v15 = vadd.f32 %v720_v0, %v630_v14  ;;  %v836_v16 = vpop.f32.mrb[5].mxu1 }
 0x3f0   :  { %v633_v17 = vpop.f32.mrb[6].mxu1 }
 0x3f1   :  { %v634_v18 = vadd.f32 %v720_v0, %v633_v17  ;;  %v837_v19 = vpop.f32.mrb[7].mxu1  ;;  %v640_v20 = vsel %vm639_vm1, %v631_v15, -1e+30 }
 0x3f2   :  { %642 = vmax.xlane.f32.xlu0 %v640_v20 }
 0x3f3   :  { %v641_v21 = vsel %vm639_vm1, %v634_v18, -1e+30 }
 0x3f6   :  { %644 = vmax.xlane.f32.xlu0 %v641_v21 }
 0x47f   :  { %v643_v22 = vpop.xlane.xlu0 %642 }
 0x480   :  { %v646_v23 = vsub.f32 %v640_v20, %v643_v22 }
 0x482   :  { %v648_v24 = vmul.f32 1.442695, %v646_v23 }
 0x483   :  { %v645_v25 = vpop.xlane.xlu0 %644 }
 0x484   :  { %v647_v26 = vsub.f32 %v641_v21, %v645_v25  ;;  %897 = vpow2.f32 %v648_v24 }
 0x486   :  { %v650_v27 = vmul.f32 1.442695, %v647_v26 }
 0x488   :  { %899 = vpow2.f32 %v650_v27 }
 0x48e   :  { %v898_v28 = vpop.eup %897 }
 0x48f   :  { %652 = vadd.xlane.f32.xlu1 %v898_v28 }
 0x492   :  { %v900_v29 = vpop.eup %899 }
 0x493   :  { %654 = vadd.xlane.f32.xlu1 %v900_v29 }
 0x51c   :  { %v653_v30 = vpop.xlane.xlu1 %652 }
 0x51d   :  { %901 = vlog2.f32 %v653_v30 }
 0x520   :  { %v655_v31 = vpop.xlane.xlu1 %654 }
 0x521   :  { %903 = vlog2.f32 %v655_v31 }
 0x527   :  { %v902_v32 = vpop.eup %901 }
 0x528   :  { %v657_v33 = vmul.f32 0.6931472, %v902_v32 }
 0x52a   :  { %v660_v34 = vsub.f32 %v646_v23, %v657_v33 }
 0x52b   :  { %v904_v35 = vpop.eup %903 }
 0x52c   :  { %662 = vst [vmem:[#allocation13] sm:$0xff] %v660_v34  ;;  %v659_v36 = vmul.f32 0.6931472, %v904_v35 }
 0x52e   :  { %v661_v37 = vsub.f32 %v647_v26, %v659_v36 }
 0x530   :  { %663 = vst [vmem:[#allocation13 + $0x8] sm:$0xff] %v661_v37 }
 0x531   :  { %1026 = shalt.err (!%p1023_p2)
}
 0x532   :  { %s1027_s19 = scalar_lea.hbm %s1254_s10, 256 }
 0x533   :  { %p1028_p3 = scmp.ne.s32.totalorder %s1254_s10, %s1027_s19  ;;  %p1031_p4 = scmp.lt.u32.totalorder %s1027_s19, %s1254_s10 }
 0x535   :  { %p1033_p5 = pnand %p1031_p4, %p1028_p3 }
 0x537   :  { %1036 = shalt.err (!%p1033_p5)
}
 0x538   :  { %675 = dma.vmem_to_hbm [thread:$0]  %s670_s9, 256, %s1254_s10, [#allocation6], %s1050_s6, %s1050_s6, %s1051_s26  }
 0x539   :  { %1043 = dma.done.wait [#allocation6], 256  }
 0x53a   :  { %1044 = vsyncadd [#allocation6], 4294967040 }
 0x53b   :  { %679 = vsyncpa [#allocation5], 1 }
 0x53c   :  { %680 = vsyncpa [#allocation8], 1 }
 0x53d   :  { %681 = vsyncpa [#allocation11], 1 }
 0x53e   :  { %682 = vsyncpa [#allocation6], 1 }

</bundles_post_ra>
